<compile_context>
chip_gen: v7x
topology: tpu7x:2x2x1
jax: 0.10.0
libtpu: 0.0.40
codegen_flags: <defaults>
</compile_context>

<pallas_src>
import jax
import jax.numpy as jnp
import numpy as np
from jax.experimental import pallas as pl
from jax.experimental.pallas import tpu as pltpu

# ---- module hyper-parameters (defaults of Predictor.__init__) ----
INPUT_DIM = 16
HIDDEN_DIM = 16
NUM_LAYERS = 5
NUM_HEADS = 2

# Use the fully-resident kernel while 2*N^2 (bf16 A) stays below this; the
# budget is conservative enough for v7x's 64 MiB VMEM.  (On v5e/v6e with
# 128 MiB this threshold could be ~2x higher.)
_A_RESIDENT_MAX_BYTES = 24 * 1024 * 1024
_VMEM_CAP_BYTES = 64 * 1024 * 1024  # safe on all of v5e / v6e / v7x


# --------------------------------------------------------------------------
# Kernels
# --------------------------------------------------------------------------
def predictor_resident_kernel(a_ref, x_ref, w1_ref, b1_ref, w2_ref, b2_ref,
                              hw1_ref, hb1_ref, hw2_ref, hb2_ref, out_ref):
    """Single-invocation kernel; everything resident in VMEM.

    a_ref  : (N, N)     bf16  A_hat = A + I  (A[dst, src] = edge multiplicity)
    x_ref  : (N, F)     f32   node features
    w1_ref : (L, F, H)  f32   stacked first linears of the GIN MLPs (x @ W)
    b1_ref : (L, 1, H)  f32
    w2_ref : (L, H, H)  f32   stacked second linears
    b2_ref : (L, 1, H)  f32
    hw1_ref: (H, J*H)   f32   both head first-linears lane-concatenated
    hb1_ref: (1, J*H)   f32
    hw2_ref: (J*H, J)   f32   block-diagonal head second-linears
    hb2_ref: (1, J)     f32
    out_ref: (N, J)     f32
    """
    a = a_ref[...]                      # bf16, no f32 upcast copy
    x = x_ref[...]                      # f32

    # GIN stack: (1+eps)*x + agg == A_hat @ x  (eps = 0).
    # Propagation runs bf16 x bf16 -> f32 accumulate (fast MXU path);
    # bias add / ReLU stay f32 (v5e VPU has no bf16 elementwise).
    for i in range(NUM_LAYERS):
        h = jnp.dot(a, x.astype(jnp.bfloat16),
                    preferred_element_type=jnp.float32)
        h = jnp.dot(h, w1_ref[i], preferred_element_type=jnp.float32) + b1_ref[i]
        h = jnp.maximum(h, 0.0)
        x = jnp.dot(h, w2_ref[i], preferred_element_type=jnp.float32) + b2_ref[i]

    # Fused per-head output MLPs (share_params=True => both heads read same x).
    h = jnp.dot(x, hw1_ref[...], preferred_element_type=jnp.float32) + hb1_ref[...]
    h = jnp.maximum(h, 0.0)
    # (N, J) store is only J=2 lanes wide (masked store) but is negligible
    # next to the O(N^2) A traffic; revisit if the head count ever grows.
    out_ref[...] = (jnp.dot(h, hw2_ref[...], preferred_element_type=jnp.float32)
                    + hb2_ref[...])


def predictor_streamed_kernel(a_ref, x0_ref, w1_ref, b1_ref, w2_ref, b2_ref,
                              hw1_ref, hb1_ref, hw2_ref, hb2_ref, out_ref,
                              x_scratch):
    """Row-tiled streamed kernel.  grid = (NUM_LAYERS, N_pad // TILE_N).

    a_ref    : (TILE_N, N_pad) bf16  current row-tile of A_hat (re-read per layer)
    x0_ref   : (N_pad, F)      f32   initial node features (resident)
    out_ref  : (N_pad, J)      f32   resident output block
    x_scratch: (2, N_pad, H)   f32   ping-pong node-feature state across layers
    """
    l = pl.program_id(0)                      # layer (outer, sequential)
    t = pl.program_id(1)                      # row tile (inner)
    n_layers = pl.num_programs(0)
    tile_n = a_ref.shape[0]

    @pl.when(jnp.logical_and(l == 0, t == 0))
    def _():
        x_scratch[0] = x0_ref[...]            # seed layer-0 input

    read = l % 2
    write = (l + 1) % 2

    x_in = x_scratch[read]                    # (N_pad, H) f32
    h = jnp.dot(a_ref[...], x_in.astype(jnp.bfloat16),
                preferred_element_type=jnp.float32)          # (TILE_N, H)
    h = jnp.dot(h, w1_ref[l], preferred_element_type=jnp.float32) + b1_ref[l]
    h = jnp.maximum(h, 0.0)
    xt = jnp.dot(h, w2_ref[l], preferred_element_type=jnp.float32) + b2_ref[l]

    row0 = pl.multiple_of(t * tile_n, tile_n)
    x_scratch[write, pl.ds(row0, tile_n), :] = xt

    @pl.when(l == n_layers - 1)
    def _():
        hh = jnp.dot(xt, hw1_ref[...], preferred_element_type=jnp.float32) \
             + hb1_ref[...]
        hh = jnp.maximum(hh, 0.0)
        out_ref[pl.ds(row0, tile_n), :] = (
            jnp.dot(hh, hw2_ref[...], preferred_element_type=jnp.float32)
            + hb2_ref[...])


# --------------------------------------------------------------------------
# Wrapper glue
# --------------------------------------------------------------------------
def _pack_head_params(params):
    """Fuse the per-head output MLPs: lane-concat first linears, block-diag second."""
    J, H = NUM_HEADS, HIDDEN_DIM
    hw1p = jnp.concatenate([params["hw1"][j] for j in range(J)], axis=1)      # (H, J*H)
    hb1p = params["hb1"][:, 0, :].reshape(1, J * H)                           # (1, J*H)
    hw2p = jax.scipy.linalg.block_diag(*[params["hw2"][j] for j in range(J)]) # (J*H, J)
    hb2p = params["hb2"][:, 0, 0].reshape(1, J)                               # (1, J)
    return hw1p, hb1p, hw2p, hb2p


def _build_a_hat(edge_index, n, n_pad):
    """A_hat = A + I (bf16).  Self-loop folds the GIN (1+eps)*x term (eps=0).

    bf16 is exact while (edge multiplicity + 1) stays a small integer (<= ~255).
    """
    src, dst = edge_index[0], edge_index[1]
    a = jnp.zeros((n_pad, n_pad), jnp.float32).at[dst, src].add(1.0)
    a = a + jnp.eye(n_pad, dtype=jnp.float32)
    return a.astype(jnp.bfloat16)


def _vmem_limit(bytes_needed):
    return int(min(_VMEM_CAP_BYTES, max(16 * 1024 * 1024, bytes_needed)))


def _cost_estimate(n, a_reads):
    H, L, J = HIDDEN_DIM, NUM_LAYERS, NUM_HEADS
    flops = (L * (2 * n * n * H + 4 * n * H * H)
             + 2 * n * H * (J * H) + 2 * n * (J * H) * J)
    weight_bytes = 4 * (L * (2 * H * H + 2 * H) + H * J * H + J * H + J * H * J + J)
    bytes_accessed = a_reads * 2 * n * n + 4 * n * H + 4 * n * J + weight_bytes
    return pl.CostEstimate(flops=flops, transcendentals=0,
                           bytes_accessed=bytes_accessed)


def _forward_resident(X, edge_index, params):
    N = X.shape[0]
    A_hat = _build_a_hat(edge_index, N, N)
    hw1p, hb1p, hw2p, hb2p = _pack_head_params(params)
    args = (A_hat, X, params["w1"], params["b1"], params["w2"], params["b2"],
            hw1p, hb1p, hw2p, hb2p)

    vmem = pl.BlockSpec(memory_space=pltpu.MemorySpace.VMEM)
    a_bytes = 2 * N * N
    return pl.pallas_call(
        predictor_resident_kernel,
        out_shape=jax.ShapeDtypeStruct((N, NUM_HEADS), jnp.float32),
        in_specs=[vmem] * len(args),
        out_specs=vmem,
        compiler_params=pltpu.CompilerParams(
            vmem_limit_bytes=_vmem_limit(2 * a_bytes + (8 << 20))),
        cost_estimate=_cost_estimate(N, a_reads=1),
    )(*args)


def _forward_streamed(X, edge_index, params, tile_n):
    N, F = X.shape
    H, L, J = HIDDEN_DIM, NUM_LAYERS, NUM_HEADS
    n_tiles = -(-N // tile_n)
    n_pad = n_tiles * tile_n

    # Padded rows/cols of A_hat are zero off-diagonal, so padded (zero) nodes
    # never contaminate real rows; padded outputs are sliced off below.
    A_hat = _build_a_hat(edge_index, N, n_pad)
    Xp = jnp.zeros((n_pad, F), jnp.float32).at[:N].set(X)
    hw1p, hb1p, hw2p, hb2p = _pack_head_params(params)
    args = (A_hat, Xp, params["w1"], params["b1"], params["w2"], params["b2"],
            hw1p, hb1p, hw2p, hb2p)

    def full(arr):
        nd = arr.ndim
        return pl.BlockSpec(arr.shape, lambda l, t, _nd=nd: (0,) * _nd)

    in_specs = [
        pl.BlockSpec((tile_n, n_pad), lambda l, t: (t, 0)),   # stream A row-tiles
        full(Xp),
        full(params["w1"]), full(params["b1"]),
        full(params["w2"]), full(params["b2"]),
        full(hw1p), full(hb1p), full(hw2p), full(hb2p),
    ]
    out_specs = pl.BlockSpec((n_pad, NUM_HEADS), lambda l, t: (0, 0))

    tile_a_bytes = tile_n * n_pad * 2
    vmem_limit = _vmem_limit(3 * tile_a_bytes + 4 * n_pad * H * 4 + (16 << 20))

    out = pl.pallas_call(
        predictor_streamed_kernel,
        out_shape=jax.ShapeDtypeStruct((n_pad, NUM_HEADS), jnp.float32),
        grid_spec=pltpu.PrefetchScalarGridSpec(
            num_scalar_prefetch=0,
            grid=(L, n_tiles),                   # layer axis MUST be outer/sequential
            in_specs=in_specs,
            out_specs=out_specs,
            scratch_shapes=[pltpu.VMEM((2, n_pad, H), jnp.float32)],
        ),
        compiler_params=pltpu.CompilerParams(
            dimension_semantics=("arbitrary", "arbitrary"),
            vmem_limit_bytes=vmem_limit),
        cost_estimate=_cost_estimate(n_pad, a_reads=L),
    )(*args)
    return out[:N]


def predictor_forward(X, edge_index, params, *, force_streamed=False, tile_n=256):
    """Forward pass of Predictor (gin / share_params / relu / no dropout)."""
    N = X.shape[0]
    if force_streamed or 2 * N * N > _A_RESIDENT_MAX_BYTES:
        return _forward_streamed(X, edge_index, params, tile_n)
    return _forward_resident(X, edge_index, params)


# --------------------------------------------------------------------------
# Reference + params
# --------------------------------------------------------------------------
def reference_forward(X, edge_index, params):
    """Pure-JAX f32 reference for correctness check."""
    N = X.shape[0]
    src, dst = edge_index[0], edge_index[1]
    A = jnp.zeros((N, N), jnp.float32).at[dst, src].add(1.0)
    x = X
    for i in range(NUM_LAYERS):
        h = x + A @ x
        h = jnp.maximum(h @ params["w1"][i] + params["b1"][i, 0], 0.0)
        x = h @ params["w2"][i] + params["b2"][i, 0]
    props = []
    for j in range(NUM_HEADS):
        h = jnp.maximum(x @ params["hw1"][j] + params["hb1"][j, 0], 0.0)
        props.append(h @ params["hw2"][j] + params["hb2"][j, 0])
    return jnp.concatenate(props, axis=-1)


def make_params(key):
    """nn.init.normal_-style parameters.

    PyTorch Linear computes y = x @ W.T + b with W of shape (out, in);
    weights are stored pre-transposed as (in, out) so kernels do x @ W.
    """
    ks = list(jax.random.split(key, 8))
    p = {}
    # GIN layer MLPs (layer 1 input dim == INPUT_DIM == HIDDEN_DIM here)
    p["w1"] = jax.random.normal(ks[0], (NUM_LAYERS, INPUT_DIM, HIDDEN_DIM), jnp.float32)
    p["b1"] = jax.random.normal(ks[1], (NUM_LAYERS, 1, HIDDEN_DIM), jnp.float32)
    p["w2"] = jax.random.normal(ks[2], (NUM_LAYERS, HIDDEN_DIM, HIDDEN_DIM), jnp.float32)
    p["b2"] = jax.random.normal(ks[3], (NUM_LAYERS, 1, HIDDEN_DIM), jnp.float32)
    # per-head output MLPs: Linear(H, H) -> ReLU -> Linear(H, 1)
    p["hw1"] = jax.random.normal(ks[4], (NUM_HEADS, HIDDEN_DIM, HIDDEN_DIM), jnp.float32)
    p["hb1"] = jax.random.normal(ks[5], (NUM_HEADS, 1, HIDDEN_DIM), jnp.float32)
    p["hw2"] = jax.random.normal(ks[6], (NUM_HEADS, HIDDEN_DIM, 1), jnp.float32)
    p["hb2"] = jax.random.normal(ks[7], (NUM_HEADS, 1, 1), jnp.float32)
    return p


def _check(out, ref, shape, tol=5e-2):
    out = np.asarray(out)
    ref = np.asarray(ref)
    assert out.shape == shape, out.shape
    # bf16 aggregation operands -> compare scale-relative (f32 reference).
    err = np.max(np.abs(out - ref)) / (np.max(np.abs(ref)) + 1e-6)
    assert err < tol, f"mismatch vs reference, scale-relative err={err}"


if __name__ == "__main__":
    key = jax.random.PRNGKey(0)
    k_x, k_e, k_p, k_x2, k_e2 = jax.random.split(key, 5)
    params = make_params(k_p)

    # --- small graph: fully-resident path ---
    N1, E1 = 8, 16
    X1 = jax.random.normal(k_x, (N1, INPUT_DIM), jnp.float32)
    edge_index1 = jax.random.randint(k_e, (2, E1), 0, N1, jnp.int32)
    out1 = jax.block_until_ready(predictor_forward(X1, edge_index1, params))
    ref1 = jax.block_until_ready(reference_forward(X1, edge_index1, params))
    _check(out1, ref1, (N1, NUM_HEADS))

    # --- larger graph: row-tiled streamed path (forced, small tile for test) ---
    N2, E2 = 100, 400
    X2 = jax.random.normal(k_x2, (N2, INPUT_DIM), jnp.float32)
    edge_index2 = jax.random.randint(k_e2, (2, E2), 0, N2, jnp.int32)
    out2 = jax.block_until_ready(
        predictor_forward(X2, edge_index2, params, force_streamed=True, tile_n=64))
    ref2 = jax.block_until_ready(reference_forward(X2, edge_index2, params))
    _check(out2, ref2, (N2, NUM_HEADS))

    print("KERNEL_OK")
</pallas_src>

<mosaic_0001>
module attributes {stable_mosaic.version = 11 : i64} {
  func.func @predictor_resident_kernel(%arg0: memref<8x8xbf16, #tpu.memory_space<vmem>>, %arg1: memref<8x16xf32, #tpu.memory_space<vmem>>, %arg2: memref<5x16x16xf32, #tpu.memory_space<vmem>>, %arg3: memref<5x1x16xf32, #tpu.memory_space<vmem>>, %arg4: memref<5x16x16xf32, #tpu.memory_space<vmem>>, %arg5: memref<5x1x16xf32, #tpu.memory_space<vmem>>, %arg6: memref<16x32xf32, #tpu.memory_space<vmem>>, %arg7: memref<1x32xf32, #tpu.memory_space<vmem>>, %arg8: memref<32x2xf32, #tpu.memory_space<vmem>>, %arg9: memref<1x2xf32, #tpu.memory_space<vmem>>, %arg10: memref<8x2xf32, #tpu.memory_space<vmem>>) attributes {dimension_semantics = [], scalar_prefetch = 0 : i64, scratch_operands = 0 : i64, tpu.core_type = #tpu.core_type<tc>} {
    %c0 = arith.constant 0 : index
    %c0_0 = arith.constant 0 : index
    %0 = vector.load %arg0[%c0, %c0_0] : memref<8x8xbf16, #tpu.memory_space<vmem>>, vector<8x8xbf16>
    %c0_1 = arith.constant 0 : index
    %c0_2 = arith.constant 0 : index
    %1 = vector.load %arg1[%c0_1, %c0_2] : memref<8x16xf32, #tpu.memory_space<vmem>>, vector<8x16xf32>
    %2 = arith.truncf %1 : vector<8x16xf32> to vector<8x16xbf16>
    %cst = arith.constant dense<0.000000e+00> : vector<8x16xf32>
    %3 = tpu.matmul %0, %2, %cst {dimension_numbers = #tpu.dot_dimension_numbers<[1], [0], [0], [1], [0, 0, 1, 1], [], []>} : vector<8x8xbf16>, vector<8x16xbf16>, vector<8x16xf32> -> vector<8x16xf32>
    %c0_3 = arith.constant 0 : index
    %c0_4 = arith.constant 0 : index
    %c0_5 = arith.constant 0 : index
    %4 = vector.load %arg2[%c0_3, %c0_4, %c0_5] : memref<5x16x16xf32, #tpu.memory_space<vmem>>, vector<1x16x16xf32>
    %5 = vector.shape_cast %4 : vector<1x16x16xf32> to vector<16x16xf32>
    %cst_6 = arith.constant dense<0.000000e+00> : vector<8x16xf32>
    %6 = tpu.matmul %3, %5, %cst_6 {dimension_numbers = #tpu.dot_dimension_numbers<[1], [0], [0], [1], [0, 0, 1, 1], [], []>} : vector<8x16xf32>, vector<16x16xf32>, vector<8x16xf32> -> vector<8x16xf32>
    %c0_7 = arith.constant 0 : index
    %c0_8 = arith.constant 0 : index
    %c0_9 = arith.constant 0 : index
    %7 = vector.load %arg3[%c0_7, %c0_8, %c0_9] : memref<5x1x16xf32, #tpu.memory_space<vmem>>, vector<1x1x16xf32>
    %8 = vector.shape_cast %7 : vector<1x1x16xf32> to vector<1x16xf32>
    %9 = vector.broadcast %8 : vector<1x16xf32> to vector<8x16xf32>
    %10 = arith.addf %6, %9 : vector<8x16xf32>
    %cst_10 = arith.constant 0.000000e+00 : f32
    %11 = vector.broadcast %cst_10 : f32 to vector<8x16xf32>
    %12 = arith.maximumf %10, %11 : vector<8x16xf32>
    %c0_11 = arith.constant 0 : index
    %c0_12 = arith.constant 0 : index
    %c0_13 = arith.constant 0 : index
    %13 = vector.load %arg4[%c0_11, %c0_12, %c0_13] : memref<5x16x16xf32, #tpu.memory_space<vmem>>, vector<1x16x16xf32>
    %14 = vector.shape_cast %13 : vector<1x16x16xf32> to vector<16x16xf32>
    %cst_14 = arith.constant dense<0.000000e+00> : vector<8x16xf32>
    %15 = tpu.matmul %12, %14, %cst_14 {dimension_numbers = #tpu.dot_dimension_numbers<[1], [0], [0], [1], [0, 0, 1, 1], [], []>} : vector<8x16xf32>, vector<16x16xf32>, vector<8x16xf32> -> vector<8x16xf32>
    %c0_15 = arith.constant 0 : index
    %c0_16 = arith.constant 0 : index
    %c0_17 = arith.constant 0 : index
    %16 = vector.load %arg5[%c0_15, %c0_16, %c0_17] : memref<5x1x16xf32, #tpu.memory_space<vmem>>, vector<1x1x16xf32>
    %17 = vector.shape_cast %16 : vector<1x1x16xf32> to vector<1x16xf32>
    %18 = vector.broadcast %17 : vector<1x16xf32> to vector<8x16xf32>
    %19 = arith.addf %15, %18 : vector<8x16xf32>
    %20 = arith.truncf %19 : vector<8x16xf32> to vector<8x16xbf16>
    %cst_18 = arith.constant dense<0.000000e+00> : vector<8x16xf32>
    %21 = tpu.matmul %0, %20, %cst_18 {dimension_numbers = #tpu.dot_dimension_numbers<[1], [0], [0], [1], [0, 0, 1, 1], [], []>} : vector<8x8xbf16>, vector<8x16xbf16>, vector<8x16xf32> -> vector<8x16xf32>
    %c1 = arith.constant 1 : index
    %c0_19 = arith.constant 0 : index
    %c0_20 = arith.constant 0 : index
    %22 = vector.load %arg2[%c1, %c0_19, %c0_20] : memref<5x16x16xf32, #tpu.memory_space<vmem>>, vector<1x16x16xf32>
    %23 = vector.shape_cast %22 : vector<1x16x16xf32> to vector<16x16xf32>
    %cst_21 = arith.constant dense<0.000000e+00> : vector<8x16xf32>
    %24 = tpu.matmul %21, %23, %cst_21 {dimension_numbers = #tpu.dot_dimension_numbers<[1], [0], [0], [1], [0, 0, 1, 1], [], []>} : vector<8x16xf32>, vector<16x16xf32>, vector<8x16xf32> -> vector<8x16xf32>
    %c1_22 = arith.constant 1 : index
    %c0_23 = arith.constant 0 : index
    %c0_24 = arith.constant 0 : index
    %25 = vector.load %arg3[%c1_22, %c0_23, %c0_24] : memref<5x1x16xf32, #tpu.memory_space<vmem>>, vector<1x1x16xf32>
    %26 = vector.shape_cast %25 : vector<1x1x16xf32> to vector<1x16xf32>
    %27 = vector.broadcast %26 : vector<1x16xf32> to vector<8x16xf32>
    %28 = arith.addf %24, %27 : vector<8x16xf32>
    %cst_25 = arith.constant 0.000000e+00 : f32
    %29 = vector.broadcast %cst_25 : f32 to vector<8x16xf32>
    %30 = arith.maximumf %28, %29 : vector<8x16xf32>
    %c1_26 = arith.constant 1 : index
    %c0_27 = arith.constant 0 : index
    %c0_28 = arith.constant 0 : index
    %31 = vector.load %arg4[%c1_26, %c0_27, %c0_28] : memref<5x16x16xf32, #tpu.memory_space<vmem>>, vector<1x16x16xf32>
    %32 = vector.shape_cast %31 : vector<1x16x16xf32> to vector<16x16xf32>
    %cst_29 = arith.constant dense<0.000000e+00> : vector<8x16xf32>
    %33 = tpu.matmul %30, %32, %cst_29 {dimension_numbers = #tpu.dot_dimension_numbers<[1], [0], [0], [1], [0, 0, 1, 1], [], []>} : vector<8x16xf32>, vector<16x16xf32>, vector<8x16xf32> -> vector<8x16xf32>
    %c1_30 = arith.constant 1 : index
    %c0_31 = arith.constant 0 : index
    %c0_32 = arith.constant 0 : index
    %34 = vector.load %arg5[%c1_30, %c0_31, %c0_32] : memref<5x1x16xf32, #tpu.memory_space<vmem>>, vector<1x1x16xf32>
    %35 = vector.shape_cast %34 : vector<1x1x16xf32> to vector<1x16xf32>
    %36 = vector.broadcast %35 : vector<1x16xf32> to vector<8x16xf32>
    %37 = arith.addf %33, %36 : vector<8x16xf32>
    %38 = arith.truncf %37 : vector<8x16xf32> to vector<8x16xbf16>
    %cst_33 = arith.constant dense<0.000000e+00> : vector<8x16xf32>
    %39 = tpu.matmul %0, %38, %cst_33 {dimension_numbers = #tpu.dot_dimension_numbers<[1], [0], [0], [1], [0, 0, 1, 1], [], []>} : vector<8x8xbf16>, vector<8x16xbf16>, vector<8x16xf32> -> vector<8x16xf32>
    %c2 = arith.constant 2 : index
    %c0_34 = arith.constant 0 : index
    %c0_35 = arith.constant 0 : index
    %40 = vector.load %arg2[%c2, %c0_34, %c0_35] : memref<5x16x16xf32, #tpu.memory_space<vmem>>, vector<1x16x16xf32>
    %41 = vector.shape_cast %40 : vector<1x16x16xf32> to vector<16x16xf32>
    %cst_36 = arith.constant dense<0.000000e+00> : vector<8x16xf32>
    %42 = tpu.matmul %39, %41, %cst_36 {dimension_numbers = #tpu.dot_dimension_numbers<[1], [0], [0], [1], [0, 0, 1, 1], [], []>} : vector<8x16xf32>, vector<16x16xf32>, vector<8x16xf32> -> vector<8x16xf32>
    %c2_37 = arith.constant 2 : index
    %c0_38 = arith.constant 0 : index
    %c0_39 = arith.constant 0 : index
    %43 = vector.load %arg3[%c2_37, %c0_38, %c0_39] : memref<5x1x16xf32, #tpu.memory_space<vmem>>, vector<1x1x16xf32>
    %44 = vector.shape_cast %43 : vector<1x1x16xf32> to vector<1x16xf32>
    %45 = vector.broadcast %44 : vector<1x16xf32> to vector<8x16xf32>
    %46 = arith.addf %42, %45 : vector<8x16xf32>
    %cst_40 = arith.constant 0.000000e+00 : f32
    %47 = vector.broadcast %cst_40 : f32 to vector<8x16xf32>
    %48 = arith.maximumf %46, %47 : vector<8x16xf32>
    %c2_41 = arith.constant 2 : index
    %c0_42 = arith.constant 0 : index
    %c0_43 = arith.constant 0 : index
    %49 = vector.load %arg4[%c2_41, %c0_42, %c0_43] : memref<5x16x16xf32, #tpu.memory_space<vmem>>, vector<1x16x16xf32>
    %50 = vector.shape_cast %49 : vector<1x16x16xf32> to vector<16x16xf32>
    %cst_44 = arith.constant dense<0.000000e+00> : vector<8x16xf32>
    %51 = tpu.matmul %48, %50, %cst_44 {dimension_numbers = #tpu.dot_dimension_numbers<[1], [0], [0], [1], [0, 0, 1, 1], [], []>} : vector<8x16xf32>, vector<16x16xf32>, vector<8x16xf32> -> vector<8x16xf32>
    %c2_45 = arith.constant 2 : index
    %c0_46 = arith.constant 0 : index
    %c0_47 = arith.constant 0 : index
    %52 = vector.load %arg5[%c2_45, %c0_46, %c0_47] : memref<5x1x16xf32, #tpu.memory_space<vmem>>, vector<1x1x16xf32>
    %53 = vector.shape_cast %52 : vector<1x1x16xf32> to vector<1x16xf32>
    %54 = vector.broadcast %53 : vector<1x16xf32> to vector<8x16xf32>
    %55 = arith.addf %51, %54 : vector<8x16xf32>
    %56 = arith.truncf %55 : vector<8x16xf32> to vector<8x16xbf16>
    %cst_48 = arith.constant dense<0.000000e+00> : vector<8x16xf32>
    %57 = tpu.matmul %0, %56, %cst_48 {dimension_numbers = #tpu.dot_dimension_numbers<[1], [0], [0], [1], [0, 0, 1, 1], [], []>} : vector<8x8xbf16>, vector<8x16xbf16>, vector<8x16xf32> -> vector<8x16xf32>
    %c3 = arith.constant 3 : index
    %c0_49 = arith.constant 0 : index
    %c0_50 = arith.constant 0 : index
    %58 = vector.load %arg2[%c3, %c0_49, %c0_50] : memref<5x16x16xf32, #tpu.memory_space<vmem>>, vector<1x16x16xf32>
    %59 = vector.shape_cast %58 : vector<1x16x16xf32> to vector<16x16xf32>
    %cst_51 = arith.constant dense<0.000000e+00> : vector<8x16xf32>
    %60 = tpu.matmul %57, %59, %cst_51 {dimension_numbers = #tpu.dot_dimension_numbers<[1], [0], [0], [1], [0, 0, 1, 1], [], []>} : vector<8x16xf32>, vector<16x16xf32>, vector<8x16xf32> -> vector<8x16xf32>
    %c3_52 = arith.constant 3 : index
    %c0_53 = arith.constant 0 : index
    %c0_54 = arith.constant 0 : index
    %61 = vector.load %arg3[%c3_52, %c0_53, %c0_54] : memref<5x1x16xf32, #tpu.memory_space<vmem>>, vector<1x1x16xf32>
    %62 = vector.shape_cast %61 : vector<1x1x16xf32> to vector<1x16xf32>
    %63 = vector.broadcast %62 : vector<1x16xf32> to vector<8x16xf32>
    %64 = arith.addf %60, %63 : vector<8x16xf32>
    %cst_55 = arith.constant 0.000000e+00 : f32
    %65 = vector.broadcast %cst_55 : f32 to vector<8x16xf32>
    %66 = arith.maximumf %64, %65 : vector<8x16xf32>
    %c3_56 = arith.constant 3 : index
    %c0_57 = arith.constant 0 : index
    %c0_58 = arith.constant 0 : index
    %67 = vector.load %arg4[%c3_56, %c0_57, %c0_58] : memref<5x16x16xf32, #tpu.memory_space<vmem>>, vector<1x16x16xf32>
    %68 = vector.shape_cast %67 : vector<1x16x16xf32> to vector<16x16xf32>
    %cst_59 = arith.constant dense<0.000000e+00> : vector<8x16xf32>
    %69 = tpu.matmul %66, %68, %cst_59 {dimension_numbers = #tpu.dot_dimension_numbers<[1], [0], [0], [1], [0, 0, 1, 1], [], []>} : vector<8x16xf32>, vector<16x16xf32>, vector<8x16xf32> -> vector<8x16xf32>
    %c3_60 = arith.constant 3 : index
    %c0_61 = arith.constant 0 : index
    %c0_62 = arith.constant 0 : index
    %70 = vector.load %arg5[%c3_60, %c0_61, %c0_62] : memref<5x1x16xf32, #tpu.memory_space<vmem>>, vector<1x1x16xf32>
    %71 = vector.shape_cast %70 : vector<1x1x16xf32> to vector<1x16xf32>
    %72 = vector.broadcast %71 : vector<1x16xf32> to vector<8x16xf32>
    %73 = arith.addf %69, %72 : vector<8x16xf32>
    %74 = arith.truncf %73 : vector<8x16xf32> to vector<8x16xbf16>
    %cst_63 = arith.constant dense<0.000000e+00> : vector<8x16xf32>
    %75 = tpu.matmul %0, %74, %cst_63 {dimension_numbers = #tpu.dot_dimension_numbers<[1], [0], [0], [1], [0, 0, 1, 1], [], []>} : vector<8x8xbf16>, vector<8x16xbf16>, vector<8x16xf32> -> vector<8x16xf32>
    %c4 = arith.constant 4 : index
    %c0_64 = arith.constant 0 : index
    %c0_65 = arith.constant 0 : index
    %76 = vector.load %arg2[%c4, %c0_64, %c0_65] : memref<5x16x16xf32, #tpu.memory_space<vmem>>, vector<1x16x16xf32>
    %77 = vector.shape_cast %76 : vector<1x16x16xf32> to vector<16x16xf32>
    %cst_66 = arith.constant dense<0.000000e+00> : vector<8x16xf32>
    %78 = tpu.matmul %75, %77, %cst_66 {dimension_numbers = #tpu.dot_dimension_numbers<[1], [0], [0], [1], [0, 0, 1, 1], [], []>} : vector<8x16xf32>, vector<16x16xf32>, vector<8x16xf32> -> vector<8x16xf32>
    %c4_67 = arith.constant 4 : index
    %c0_68 = arith.constant 0 : index
    %c0_69 = arith.constant 0 : index
    %79 = vector.load %arg3[%c4_67, %c0_68, %c0_69] : memref<5x1x16xf32, #tpu.memory_space<vmem>>, vector<1x1x16xf32>
    %80 = vector.shape_cast %79 : vector<1x1x16xf32> to vector<1x16xf32>
    %81 = vector.broadcast %80 : vector<1x16xf32> to vector<8x16xf32>
    %82 = arith.addf %78, %81 : vector<8x16xf32>
    %cst_70 = arith.constant 0.000000e+00 : f32
    %83 = vector.broadcast %cst_70 : f32 to vector<8x16xf32>
    %84 = arith.maximumf %82, %83 : vector<8x16xf32>
    %c4_71 = arith.constant 4 : index
    %c0_72 = arith.constant 0 : index
    %c0_73 = arith.constant 0 : index
    %85 = vector.load %arg4[%c4_71, %c0_72, %c0_73] : memref<5x16x16xf32, #tpu.memory_space<vmem>>, vector<1x16x16xf32>
    %86 = vector.shape_cast %85 : vector<1x16x16xf32> to vector<16x16xf32>
    %cst_74 = arith.constant dense<0.000000e+00> : vector<8x16xf32>
    %87 = tpu.matmul %84, %86, %cst_74 {dimension_numbers = #tpu.dot_dimension_numbers<[1], [0], [0], [1], [0, 0, 1, 1], [], []>} : vector<8x16xf32>, vector<16x16xf32>, vector<8x16xf32> -> vector<8x16xf32>
    %c4_75 = arith.constant 4 : index
    %c0_76 = arith.constant 0 : index
    %c0_77 = arith.constant 0 : index
    %88 = vector.load %arg5[%c4_75, %c0_76, %c0_77] : memref<5x1x16xf32, #tpu.memory_space<vmem>>, vector<1x1x16xf32>
    %89 = vector.shape_cast %88 : vector<1x1x16xf32> to vector<1x16xf32>
    %90 = vector.broadcast %89 : vector<1x16xf32> to vector<8x16xf32>
    %91 = arith.addf %87, %90 : vector<8x16xf32>
    %c0_78 = arith.constant 0 : index
    %c0_79 = arith.constant 0 : index
    %92 = vector.load %arg6[%c0_78, %c0_79] : memref<16x32xf32, #tpu.memory_space<vmem>>, vector<16x32xf32>
    %cst_80 = arith.constant dense<0.000000e+00> : vector<8x32xf32>
    %93 = tpu.matmul %91, %92, %cst_80 {dimension_numbers = #tpu.dot_dimension_numbers<[1], [0], [0], [1], [0, 0, 1, 1], [], []>} : vector<8x16xf32>, vector<16x32xf32>, vector<8x32xf32> -> vector<8x32xf32>
    %c0_81 = arith.constant 0 : index
    %c0_82 = arith.constant 0 : index
    %94 = vector.load %arg7[%c0_81, %c0_82] : memref<1x32xf32, #tpu.memory_space<vmem>>, vector<1x32xf32>
    %95 = vector.broadcast %94 : vector<1x32xf32> to vector<8x32xf32>
    %96 = arith.addf %93, %95 : vector<8x32xf32>
    %cst_83 = arith.constant 0.000000e+00 : f32
    %97 = vector.broadcast %cst_83 : f32 to vector<8x32xf32>
    %98 = arith.maximumf %96, %97 : vector<8x32xf32>
    %c0_84 = arith.constant 0 : index
    %c0_85 = arith.constant 0 : index
    %99 = vector.load %arg8[%c0_84, %c0_85] : memref<32x2xf32, #tpu.memory_space<vmem>>, vector<32x2xf32>
    %cst_86 = arith.constant dense<0.000000e+00> : vector<8x2xf32>
    %100 = tpu.matmul %98, %99, %cst_86 {dimension_numbers = #tpu.dot_dimension_numbers<[1], [0], [0], [1], [0, 0, 1, 1], [], []>} : vector<8x32xf32>, vector<32x2xf32>, vector<8x2xf32> -> vector<8x2xf32>
    %c0_87 = arith.constant 0 : index
    %c0_88 = arith.constant 0 : index
    %101 = vector.load %arg9[%c0_87, %c0_88] : memref<1x2xf32, #tpu.memory_space<vmem>>, vector<1x2xf32>
    %102 = vector.broadcast %101 : vector<1x2xf32> to vector<8x2xf32>
    %103 = arith.addf %100, %102 : vector<8x2xf32>
    %c0_89 = arith.constant 0 : index
    %c0_90 = arith.constant 0 : index
    %104 = vector.load %arg10[%c0_89, %c0_90] : memref<8x2xf32, #tpu.memory_space<vmem>>, vector<8x2xf32>
    tpu.vector_store %arg10[%c0_89, %c0_90], %103 {strides = array<i32>} : memref<8x2xf32, #tpu.memory_space<vmem>>, vector<8x2xf32>,
    return
  }
}

</mosaic_0001>

<bundles_post_ra>
// kernel: tpu_custom_call.1
= control target key start
LH: loop header
LB: loop body
LE: loop exit
PB: predicated region body
PF: predicated region fallthrough
CT: control target
= control target key end

     0   :  { %15 = vsyncpa [#allocation3], 0  ;;  %s1885_s0 = inlined_call_operand.hbm [shape: bf16[8,8], index: 0, kind: input, shape index: {}]   ;;  %s1886_s1 = inlined_call_operand.vmem [shape: f32[8,16], index: 1, kind: input, shape index: {}]   ;;  %s1887_s2 = inlined_call_operand.hbm [shape: f32[5,16,16], index: 2, kind: input, shape index: {}]   ;;  %s1888_s3 = inlined_call_operand.vmem [shape: f32[5,1,16], index: 3, kind: input, shape index: {}]   ;;  %s1889_s4 = inlined_call_operand.hbm [shape: f32[5,16,16], index: 4, kind: input, shape index: {}]   ;;  %s1890_s5 = inlined_call_operand.vmem [shape: f32[5,1,16], index: 5, kind: input, shape index: {}]   ;;  %s1891_s6 = inlined_call_operand.vmem [shape: f32[16,32], index: 6, kind: input, shape index: {}]   ;;  %s1892_s7 = inlined_call_operand.vmem [shape: f32[1,32], index: 7, kind: input, shape index: {}]   ;;  %s1893_s8 = inlined_call_operand.vmem [shape: f32[32,2], index: 8, kind: input, shape index: {}]   ;;  %s1894_s9 = inlined_call_operand.vmem [shape: f32[1,2], index: 9, kind: input, shape index: {}]   ;;  %s1895_s10 = inlined_call_operand.vmem [shape: f32[8,2], index: 10, kind: output, shape index: {}]  }
   0x1   :  { %16 = vsyncpa [#allocation5], 0  ;;  %s1640_s13 = smov [#allocation4]   ;;  %s1570_s17 = scalar_lea.hbm %s1887_s2, 1280 }
   0x2   :  { %s34_s14 = sshll.u32 %s1640_s13, 4  ;;  %p1571_p0 = scmp.ne.s32.totalorder %s1887_s2, %s1570_s17  ;;  %s35_s14 = int_to_ptr.vmem [resolvable:$true] %s34_s14 }
   0x3   :  { %p1574_p1 = scmp.lt.u32.totalorder %s1570_s17, %s1887_s2 }
   0x5   :  { %p1576_p2 = pnand %p1574_p1, %p1571_p0 }
   0x7   :  { %1579 = shalt.err (!%p1576_p2)
}
   0x8   :  { %s1580_s22 = scalar_lea.vmem %s35_s14, 1280  ;;  %p1585_p4 = scmp.lt.s32.totalorder %s35_s14, %s35_s14 }
   0x9   :  { %p1581_p3 = scmp.ne.s32.totalorder %s35_s14, %s1580_s22  ;;  %p1586_p5 = scmp.lt.s32.totalorder %s1580_s22, %s1580_s22 }
   0xb   :  { %p1587_p6 = por %p1586_p5, %p1585_p4 }
   0xd   :  { %p1588_p7 = pnand %p1587_p6, %p1581_p3 }
   0xf   :  { %1591 = shalt.err (!%p1588_p7)
}
  0x10   :  { %s1641_s23 = smov 128   ;;  %s1642_s24 = smov 8  }
  0x11   :  { %40 = dma.hbm_to_vmem [thread:$0]  %s1887_s2, 1280, %s35_s14, [#allocation5], %s1641_s23, %s1641_s23, %s1642_s24  }
  0x12   :  { %s1643_s27 = smov [#allocation2]   ;;  %s1644_s29 = smov [#allocation6]  }
  0x13   :  { %s23_s28 = sshll.u32 %s1643_s27, 4  ;;  %s48_s30 = sshll.u32 %s1644_s29, 4  ;;  %s24_s28 = int_to_ptr.vmem [resolvable:$true] %s23_s28  ;;  %s49_s30 = int_to_ptr.vmem [resolvable:$true] %s48_s30 }
  0x14   :  { %s1592_s13 = scalar_lea.hbm %s1885_s0, 64 }
  0x15   :  { %p1593_p8 = scmp.ne.s32.totalorder %s1885_s0, %s1592_s13  ;;  %p1596_p9 = scmp.lt.u32.totalorder %s1592_s13, %s1885_s0 }
  0x17   :  { %p1598_p10 = pnand %p1596_p9, %p1593_p8 }
  0x19   :  { %1601 = shalt.err (!%p1598_p10)
}
  0x1a   :  { %s1602_s2 = scalar_lea.vmem %s24_s28, 64  ;;  %p1607_p12 = scmp.lt.s32.totalorder %s24_s28, %s24_s28 }
  0x1b   :  { %p1603_p11 = scmp.ne.s32.totalorder %s24_s28, %s1602_s2  ;;  %p1608_p13 = scmp.lt.s32.totalorder %s1602_s2, %s1602_s2 }
  0x1d   :  { %p1609_p0 = por %p1608_p13, %p1607_p12 }
  0x1f   :  { %p1610_p1 = pnand %p1609_p0, %p1603_p11 }
  0x21   :  { %1613 = shalt.err (!%p1610_p1)
}
  0x22   :  { %26 = dma.hbm_to_vmem [thread:$0]  %s1885_s0, 64, %s24_s28, [#allocation3]  }
  0x23   :  { %s1614_s22 = scalar_lea.hbm %s1889_s4, 1280 }
  0x24   :  { %p1615_p2 = scmp.ne.s32.totalorder %s1889_s4, %s1614_s22  ;;  %p1618_p3 = scmp.lt.u32.totalorder %s1614_s22, %s1889_s4 }
  0x26   :  { %p1620_p4 = pnand %p1618_p3, %p1615_p2 }
  0x28   :  { %1623 = shalt.err (!%p1620_p4)
}
  0x29   :  { %s1624_s11 = scalar_lea.vmem %s49_s30, 1280  ;;  %p1629_p6 = scmp.lt.s32.totalorder %s49_s30, %s49_s30 }
  0x2a   :  { %p1625_p5 = scmp.ne.s32.totalorder %s49_s30, %s1624_s11  ;;  %p1630_p7 = scmp.lt.s32.totalorder %s1624_s11, %s1624_s11 }
  0x2c   :  { %p1631_p8 = por %p1630_p7, %p1629_p6 }
  0x2e   :  { %p1632_p9 = pnand %p1631_p8, %p1625_p5 }
  0x30   :  { %1635 = shalt.err (!%p1632_p9)
}
  0x31   :  { %54 = dma.hbm_to_vmem [thread:$0]  %s1889_s4, 1280, %s49_s30, [#allocation5], %s1641_s23, %s1641_s23, %s1642_s24  }
  0x32   :  { %1636 = dma.done.wait [#allocation3], 64  }
  0x33   :  { %1637 = vsyncadd [#allocation3], 4294967232 }
  0x34   :  { %1638 = dma.done.wait [#allocation5], 2560  }
  0x35   :  { %1639 = vsyncadd [#allocation5], 4294964736  ;;  %v1645_v0 = vmov 0.0   ;;  %vm1646_vm0 = vmmov 0   ;;  %v1647_v1 = vmov 0.0|0.0   ;;  %v76_v2 = vld [vmem:[%s1886_s1] sm:$0xff] }
  0x36   :  { %1405 = vmatprep.subr.bf16.mxu0 %v1645_v0  ;;  %1407 = vmatprep.mubr.msk.bf16.mxu0 %vm1646_vm0, %v1645_v0  ;;  %vm82_vm1 = vcmask 1043456   ;;  %v126_v3 = vld [vmem:[#allocation4] sm:$0xff]  ;;  %v77_v4 = vpack.c.bf16 %v76_v2, %v76_v2  ;;  %v127_v5 = vld [vmem:[#allocation4 + $0x8] sm:$0xff]  ;;  %v1755_v8 = vld [vmem:[#allocation2] sm:$0xf]  ;;  %vm78_vm2 = vcmask 64512  }
  0x37   :  { %1523 = vmatprep.subr.bf16.mxu1 %v1647_v1  ;;  %1415 = vmatprep.mubr.msk.f32.mxu1 %vm1646_vm0, %v1645_v0  ;;  %v1524_v6 = vpack.c.bf16 %v127_v5, %v126_v3  ;;  %vm135_vm3 = vcmask 130048   ;;  %v210_v13 = vld [vmem:[#allocation6] sm:$0xff]  ;;  %v211_v14 = vld [vmem:[#allocation6 + $0x8] sm:$0xff]  ;;  %v422_v34 = vld [vmem:[#allocation6 + $0x10] sm:$0xff]  ;;  %vm1238_vm4 = vcmask 261120   ;;  %vm1312_vm5 = vcmask 15360  }
  0x38   :  { %v84_v7 = vsel %vm82_vm1, %v77_v4, 0  ;;  %v1527_v15 = vpack.c.bf16 %v211_v14, %v210_v13  ;;  %v1321_v16 = vld [vmem:[%s1888_s3] ss:$0 sm:$0xff]  ;;  %v337_v21 = vld [vmem:[#allocation4 + $0x10] sm:$0xff]  ;;  %v423_v35 = vld [vmem:[#allocation6 + $0x18] sm:$0xff] }
  0x39   :  { %1406 = vmatpush3.bf16.msra.mxu0 %v84_v7  ;;  %1525 = vmatpush3.bf16.msra.mxu1 %v1524_v6  ;;  %v338_v22 = vld [vmem:[#allocation4 + $0x18] sm:$0xff]  ;;  %v1533_v36 = vpack.c.bf16 %v423_v35, %v422_v34  ;;  %v550_v42 = vld [vmem:[#allocation4 + $0x20] sm:$0xff]  ;;  %v551_v43 = vld [vmem:[#allocation4 + $0x28] sm:$0xff] }
  0x3a   :  { %1526 = vmatprep.subr.bf16.mxu1 %v1647_v1  ;;  %1425 = vmatprep.subr.bf16.mxu0 %v1645_v0  ;;  %v1530_v23 = vpack.c.bf16 %v338_v22, %v337_v21  ;;  %v1323_v24 = vld [vmem:[%s1890_s5] ss:$0 sm:$0xff]  ;;  %v1327_v37 = vld [vmem:[%s1888_s3 + $0x1] ss:$0 sm:$0xff]  ;;  %v1536_v44 = vpack.c.bf16 %v551_v43, %v550_v42  ;;  %v635_v55 = vld [vmem:[#allocation6 + $0x20] sm:$0xff] }
  0x3b   :  { %v1330_v45 = vld [vmem:[%s1890_s5 + $0x1] ss:$0 sm:$0xff]  ;;  %v1334_v58 = vld [vmem:[%s1888_s3 + $0x2] ss:$0 sm:$0xff]  ;;  %v763_v63 = vld [vmem:[#allocation4 + $0x30] sm:$0xff] }
  0x3c   :  { %1408 = vmatmul.mubr.msk.bf16.vlgmr.msra.gmra.mrb[0].mxu0 %vm78_vm2, %v1755_v8  ;;  %v636_v56 = vld [vmem:[#allocation6 + $0x28] sm:$0xff] }
  0x3d   :  { %1427 = vmatprep.mubr.msk.bf16.mxu0 %vm1646_vm0, %v1645_v0  ;;  %v1539_v57 = vpack.c.bf16 %v636_v56, %v635_v55  ;;  %v764_v2 = vld [vmem:[#allocation4 + $0x38] sm:$0xff] }
  0x3e   :  { %v1542_v3 = vpack.c.bf16 %v764_v2, %v763_v63  ;;  %v1337_v4 = vld [vmem:[%s1890_s5 + $0x2] ss:$0 sm:$0xff] }
 0x10f   :  { %v120_v9 = vpop.f32.mrb[0].mxu0 }
 0x110   :  { %v1409_v10 = vpop.f32.mrb[1].mxu0  ;;  %1416 = vmatmul.mubr.msk.f32.vlgmr.msra.gmra.mrb[0].mxu1 %vm135_vm3, %v120_v9 }
 0x111   :  { %v123_v11 = vpop.f32.mrb[2].mxu0  ;;  %1422 = vmatprep.mubr.msk.f32.mxu1 %vm1646_vm0, %v1645_v0  ;;  %1528 = vmatpush3.bf16.msra.mxu1 %v1527_v15  ;;  %v848_v15 = vld [vmem:[#allocation6 + $0x30] sm:$0xff] }
 0x112   :  { %v1410_v12 = vpop.f32.mrb[3].mxu0  ;;  %1529 = vmatprep.subr.bf16.mxu1 %v1647_v1 }
 0x1e3   :  { %v205_v17 = vpop.f32.mrb[0].mxu1 }
 0x1e4   :  { %v206_v18 = vadd.f32 %v1321_v16, %v205_v17  ;;  %v1417_v19 = vpop.f32.mrb[1].mxu1  ;;  %v849_v16 = vld [vmem:[#allocation6 + $0x38] sm:$0xff] }
 0x1e5   :  { %v1545_v17 = vpack.c.bf16 %v849_v16, %v848_v15 }
 0x1e6   :  { %v209_v20 = vmax.f32 %v206_v18, 0.0  ;;  %v1341_v18 = vld [vmem:[%s1888_s3 + $0x3] ss:$0 sm:$0xff] }
 0x1e8   :  { %1423 = vmatmul.mubr.msk.f32.vlgmr.msra.gmra.mrb[2].mxu1 %vm135_vm3, %v209_v20 }
 0x1e9   :  { %1435 = vmatprep.mubr.msk.f32.mxu1 %vm1646_vm0, %v1645_v0  ;;  %1531 = vmatpush3.bf16.msra.mxu1 %v1530_v23  ;;  %v1344_v23 = vld [vmem:[%s1890_s5 + $0x3] ss:$0 sm:$0xff] }
 0x1ea   :  { %1532 = vmatprep.subr.bf16.mxu1 %v1647_v1 }
 0x2bb   :  { %v288_v25 = vpop.f32.mrb[2].mxu1 }
 0x2bc   :  { %v289_v26 = vadd.f32 %v1323_v24, %v288_v25  ;;  %v1424_v27 = vpop.f32.mrb[3].mxu1 }
 0x2be   :  { %v292_v28 = vpack.c.bf16 %v289_v26, %v289_v26 }
 0x2c0   :  { %v294_v29 = vsel %vm82_vm1, %v292_v28, 0 }
 0x2c1   :  { %1426 = vmatpush3.bf16.msra.mxu0 %v294_v29  ;;  %v976_v29 = vld [vmem:[#allocation4 + $0x40] sm:$0xff] }
 0x2c2   :  { %1445 = vmatprep.subr.bf16.mxu0 %v1645_v0 }
 0x2c4   :  { %1428 = vmatmul.mubr.msk.bf16.vlgmr.msra.gmra.mrb[4].mxu0 %vm78_vm2, %v1755_v8 }
 0x2c5   :  { %1447 = vmatprep.mubr.msk.bf16.mxu0 %vm1646_vm0, %v1645_v0 }
 0x397   :  { %v330_v30 = vpop.f32.mrb[4].mxu0 }
 0x398   :  { %v1429_v31 = vpop.f32.mrb[5].mxu0  ;;  %1436 = vmatmul.mubr.msk.f32.vlgmr.msra.gmra.mrb[4].mxu1 %vm135_vm3, %v330_v30  ;;  %v977_v30 = vld [vmem:[#allocation4 + $0x48] sm:$0xff] }
 0x399   :  { %v333_v32 = vpop.f32.mrb[6].mxu0  ;;  %1442 = vmatprep.mubr.msk.f32.mxu1 %vm1646_vm0, %v1645_v0  ;;  %1534 = vmatpush3.bf16.msra.mxu1 %v1533_v36  ;;  %v1548_v31 = vpack.c.bf16 %v977_v30, %v976_v29  ;;  %v1061_v36 = vld [vmem:[#allocation6 + $0x40] sm:$0xff] }
 0x39a   :  { %v1430_v33 = vpop.f32.mrb[7].mxu0  ;;  %1535 = vmatprep.subr.bf16.mxu1 %v1647_v1 }
 0x46b   :  { %v416_v38 = vpop.f32.mrb[4].mxu1 }
 0x46c   :  { %v417_v39 = vadd.f32 %v1327_v37, %v416_v38  ;;  %v1437_v40 = vpop.f32.mrb[5].mxu1  ;;  %v1144_v38 = vld [vmem:[%s1891_s6] sm:$0xff] }
 0x46e   :  { %v420_v41 = vmax.f32 %v417_v39, 0.0  ;;  %v1145_v39 = vld [vmem:[%s1891_s6 + $0x8] sm:$0xff] }
 0x46f   :  { %v1554_v40 = vpack.c.bf16 %v1145_v39, %v1144_v38 }
 0x470   :  { %1443 = vmatmul.mubr.msk.f32.vlgmr.msra.gmra.mrb[6].mxu1 %vm135_vm3, %v420_v41  ;;  %v1348_v41 = vld [vmem:[%s1888_s3 + $0x4] ss:$0 sm:$0xff] }
 0x471   :  { %1455 = vmatprep.mubr.msk.f32.mxu1 %vm1646_vm0, %v1645_v0  ;;  %1537 = vmatpush3.bf16.msra.mxu1 %v1536_v44 }
 0x472   :  { %1538 = vmatprep.subr.bf16.mxu1 %v1647_v1 }
 0x543   :  { %v501_v46 = vpop.f32.mrb[6].mxu1 }
 0x544   :  { %v502_v47 = vadd.f32 %v1330_v45, %v501_v46  ;;  %v1444_v48 = vpop.f32.mrb[7].mxu1  ;;  %v1227_v46 = vld [vmem:[%s1893_s8] sm:$0xff] }
 0x546   :  { %v505_v49 = vpack.c.bf16 %v502_v47, %v502_v47  ;;  %v1228_v47 = vld [vmem:[%s1893_s8 + $0x8] sm:$0xff] }
 0x547   :  { %v1557_v48 = vpack.c.bf16 %v1228_v47, %v1227_v46 }
 0x548   :  { %v507_v50 = vsel %vm82_vm1, %v505_v49, 0  ;;  %v1351_v49 = vld [vmem:[%s1890_s5 + $0x4] ss:$0 sm:$0xff] }
 0x549   :  { %1446 = vmatpush3.bf16.msra.mxu0 %v507_v50 }
 0x54a   :  { %1465 = vmatprep.subr.bf16.mxu0 %v1645_v0 }
 0x54c   :  { %1448 = vmatmul.mubr.msk.bf16.vlgmr.msra.gmra.mrb[8].mxu0 %vm78_vm2, %v1755_v8 }
 0x54d   :  { %1467 = vmatprep.mubr.msk.bf16.mxu0 %vm1646_vm0, %v1645_v0 }
 0x61f   :  { %v543_v51 = vpop.f32.mrb[8].mxu0 }
 0x620   :  { %v1449_v52 = vpop.f32.mrb[9].mxu0  ;;  %1456 = vmatmul.mubr.msk.f32.vlgmr.msra.gmra.mrb[8].mxu1 %vm135_vm3, %v543_v51 }
 0x621   :  { %v546_v53 = vpop.f32.mrb[10].mxu0  ;;  %1462 = vmatprep.mubr.msk.f32.mxu1 %vm1646_vm0, %v1645_v0  ;;  %1540 = vmatpush3.bf16.msra.mxu1 %v1539_v57 }
 0x622   :  { %v1450_v54 = vpop.f32.mrb[11].mxu0  ;;  %1541 = vmatprep.subr.bf16.mxu1 %v1647_v1  ;;  %v1230_v53 = vld [vmem:[%s1893_s8 + $0x18] sm:$0xff] }
 0x6f3   :  { %v629_v59 = vpop.f32.mrb[8].mxu1 }
 0x6f4   :  { %v630_v60 = vadd.f32 %v1334_v58, %v629_v59  ;;  %v1457_v61 = vpop.f32.mrb[9].mxu1  ;;  %v1355_v59 = vld [vmem:[%s1894_s9] ss:$0 sm:$0xff] }
 0x6f6   :  { %v633_v62 = vmax.f32 %v630_v60, 0.0 }
 0x6f8   :  { %1463 = vmatmul.mubr.msk.f32.vlgmr.msra.gmra.mrb[10].mxu1 %vm135_vm3, %v633_v62 }
 0x6f9   :  { %1475 = vmatprep.mubr.msk.f32.mxu1 %vm1646_vm0, %v1645_v0  ;;  %1543 = vmatpush3.bf16.msra.mxu1 %v1542_v3 }
 0x6fa   :  { %1544 = vmatprep.subr.bf16.mxu1 %v1647_v1 }
 0x7cb   :  { %v714_v5 = vpop.f32.mrb[10].mxu1 }
 0x7cc   :  { %v715_v6 = vadd.f32 %v1337_v4, %v714_v5  ;;  %v1464_v7 = vpop.f32.mrb[11].mxu1 }
 0x7ce   :  { %v718_v9 = vpack.c.bf16 %v715_v6, %v715_v6 }
 0x7d0   :  { %v720_v10 = vsel %vm82_vm1, %v718_v9, 0 }
 0x7d1   :  { %1466 = vmatpush3.bf16.msra.mxu0 %v720_v10 }
 0x7d2   :  { %1485 = vmatprep.subr.bf16.mxu0 %v1645_v0 }
 0x7d4   :  { %1468 = vmatmul.mubr.msk.bf16.vlgmr.msra.gmra.mrb[12].mxu0 %vm78_vm2, %v1755_v8 }
 0x7d5   :  { %1487 = vmatprep.mubr.msk.bf16.mxu0 %vm1646_vm0, %v1645_v0 }
 0x8a7   :  { %v756_v11 = vpop.f32.mrb[12].mxu0 }
 0x8a8   :  { %v1469_v12 = vpop.f32.mrb[13].mxu0  ;;  %1476 = vmatmul.mubr.msk.f32.vlgmr.msra.gmra.mrb[12].mxu1 %vm135_vm3, %v756_v11 }
 0x8a9   :  { %v759_v13 = vpop.f32.mrb[14].mxu0  ;;  %1482 = vmatprep.mubr.msk.f32.mxu1 %vm1646_vm0, %v1645_v0  ;;  %1546 = vmatpush3.bf16.msra.mxu1 %v1545_v17 }
 0x8aa   :  { %v1470_v14 = vpop.f32.mrb[15].mxu0  ;;  %1547 = vmatprep.subr.bf16.mxu1 %v1647_v1 }
 0x97b   :  { %v842_v19 = vpop.f32.mrb[12].mxu1 }
 0x97c   :  { %v843_v20 = vadd.f32 %v1341_v18, %v842_v19  ;;  %v1477_v21 = vpop.f32.mrb[13].mxu1 }
 0x97e   :  { %v846_v22 = vmax.f32 %v843_v20, 0.0 }
 0x980   :  { %1483 = vmatmul.mubr.msk.f32.vlgmr.msra.gmra.mrb[14].mxu1 %vm135_vm3, %v846_v22 }
 0x981   :  { %1495 = vmatprep.mubr.msk.f32.mxu1 %vm1646_vm0, %v1645_v0  ;;  %1549 = vmatpush3.bf16.msra.mxu1 %v1548_v31 }
 0x982   :  { %1550 = vmatprep.subr.bf16.mxu1 %v1647_v1 }
 0xa53   :  { %v927_v24 = vpop.f32.mrb[14].mxu1 }
 0xa54   :  { %v928_v25 = vadd.f32 %v1344_v23, %v927_v24  ;;  %v1484_v26 = vpop.f32.mrb[15].mxu1 }
 0xa56   :  { %v931_v27 = vpack.c.bf16 %v928_v25, %v928_v25 }
 0xa58   :  { %v933_v28 = vsel %vm82_vm1, %v931_v27, 0 }
 0xa59   :  { %1486 = vmatpush3.bf16.msra.mxu0 %v933_v28 }
 0xa5a   :  { %1553 = vmatprep.subr.bf16.mxu0 %v1647_v1 }
 0xa5c   :  { %1488 = vmatmul.mubr.msk.bf16.vlgmr.msra.gmra.mrb[16].mxu0 %vm78_vm2, %v1755_v8  ;;  %v1062_v8 = vld [vmem:[#allocation6 + $0x48] sm:$0xff] }
 0xa5d   :  { %1509 = vmatprep.mubr.msk.f32.mxu0 %vm1646_vm0, %v1645_v0  ;;  %v1551_v37 = vpack.c.bf16 %v1062_v8, %v1061_v36  ;;  %1555 = vmatpush3.bf16.msra.mxu0 %v1554_v40 }
 0xb2f   :  { %v969_v32 = vpop.f32.mrb[16].mxu0 }
 0xb30   :  { %v1489_v33 = vpop.f32.mrb[17].mxu0  ;;  %1496 = vmatmul.mubr.msk.f32.vlgmr.msra.gmra.mrb[16].mxu1 %vm135_vm3, %v969_v32 }
 0xb31   :  { %v972_v34 = vpop.f32.mrb[18].mxu0  ;;  %1502 = vmatprep.mubr.msk.f32.mxu1 %vm1646_vm0, %v1645_v0  ;;  %1552 = vmatpush3.bf16.msra.mxu1 %v1551_v37 }
 0xb32   :  { %v1490_v35 = vpop.f32.mrb[19].mxu0  ;;  %1556 = vmatprep.subr.bf16.mxu1 %v1647_v1 }
 0xc03   :  { %v1055_v42 = vpop.f32.mrb[16].mxu1 }
 0xc04   :  { %v1056_v43 = vadd.f32 %v1348_v41, %v1055_v42  ;;  %v1497_v44 = vpop.f32.mrb[17].mxu1 }
 0xc06   :  { %v1059_v45 = vmax.f32 %v1056_v43, 0.0 }
 0xc08   :  { %1503 = vmatmul.mubr.msk.f32.vlgmr.msra.gmra.mrb[18].mxu1 %vm135_vm3, %v1059_v45 }
 0xc09   :  { %1520 = vmatprep.mubr.msk.f32.mxu1 %vm1646_vm0, %v1645_v0  ;;  %1558 = vmatpush3.bf16.msra.mxu1 %v1557_v48  ;;  %v1229_v0 = vld [vmem:[%s1893_s8 + $0x10] sm:$0xff] }
 0xc0a   :  { %1559 = vmatprep.subr.bf16.mxu1 %v1647_v1  ;;  %v1560_v54 = vpack.c.bf16 %v1230_v53, %v1229_v0  ;;  %v1353_v1 = vld [vmem:[%s1892_s7] ss:$0 sm:$0xff] }
 0xc0d   :  { %1561 = vmatpush3.bf16.msra.mxu1 %v1560_v54 }
 0xcdb   :  { %v1140_v50 = vpop.f32.mrb[18].mxu1 }
 0xcdc   :  { %v1141_v51 = vadd.f32 %v1351_v49, %v1140_v50  ;;  %v1504_v52 = vpop.f32.mrb[19].mxu1 }
 0xcde   :  { %1510 = vmatmul.mubr.msk.f32.vlgmr.msra.gmra.mrb[20].mxu0 %vm135_vm3, %v1141_v51 }
 0xdb1   :  { %v1222_v55 = vpop.f32.mrb[20].mxu0 }
 0xdb2   :  { %v1223_v56 = vadd.f32 %v1353_v1, %v1222_v55  ;;  %v1511_v57 = vpop.f32.mrb[21].mxu0 }
 0xdb4   :  { %v1226_v58 = vmax.f32 %v1223_v56, 0.0 }
 0xdb6   :  { %1521 = vmatmul.mubr.msk.f32.vlgmr.msra.gmra.mrb[20].mxu1 %vm1238_vm4, %v1226_v58 }
 0xe89   :  { %v1308_v60 = vpop.f32.mrb[20].mxu1 }
 0xe8a   :  { %v1309_v61 = vadd.f32 %v1355_v59, %v1308_v60  ;;  %v1522_v62 = vpop.f32.mrb[21].mxu1 }
 0xe8c   :  { %1313 = vst.msk [vmem:[%s1895_s10] sm:$0xff] %vm1312_vm5, %v1309_v61 }
 0xe8d   :  { %1318 = vsyncpa [#allocation3], 1 }
 0xe8e   :  { %1319 = vsyncpa [#allocation5], 1 }

</bundles_post_ra>
